<compile_context>
chip_gen: v6e
topology: v6e:2x2x1
jax: 0.10.0
libtpu: 0.0.40
codegen_flags: <defaults>
</compile_context>

<pallas_src>
import functools
import math

import jax
import jax.numpy as jnp
from jax.experimental import pallas as pl
from jax.experimental.pallas import tpu as pltpu


# ----------------------------------------------------------------------------
# Pallas kernel: fused LayerNorm(patch_dim) -> Linear -> LayerNorm(dim)
# ----------------------------------------------------------------------------
def patch_embed_kernel(x_ref, ln1w_ref, ln1b_ref, w_ref, b_ref,
                       ln2w_ref, ln2b_ref, o_ref, *, eps=1e-5):
    # x_ref: (tm, P) token tile (f32), w_ref: (P, D) bf16, o_ref: (tm, D) f32.
    x = x_ref[...].astype(jnp.float32)

    # LayerNorm over patch_dim (f32 math).
    mu = jnp.mean(x, axis=-1, keepdims=True)
    var = jnp.mean((x - mu) ** 2, axis=-1, keepdims=True)
    xn = (x - mu) * jax.lax.rsqrt(var + eps)
    xn = xn * ln1w_ref[...] + ln1b_ref[...]

    # Linear: bf16 MXU inputs, f32 accumulation, lane-dense (P, D) weight.
    y = jnp.dot(xn.astype(jnp.bfloat16), w_ref[...],
                preferred_element_type=jnp.float32) + b_ref[...]

    # LayerNorm over dim (f32 math).
    mu2 = jnp.mean(y, axis=-1, keepdims=True)
    var2 = jnp.mean((y - mu2) ** 2, axis=-1, keepdims=True)
    yn = (y - mu2) * jax.lax.rsqrt(var2 + eps)
    o_ref[...] = (yn * ln2w_ref[...] + ln2b_ref[...]).astype(o_ref.dtype)


# ----------------------------------------------------------------------------
# Wrappers
# ----------------------------------------------------------------------------
def _round_up(n, m):
    return ((n + m - 1) // m) * m


def pallas_patch_embed(tokens, params, *, block_tokens=256):
    """tokens: (M, P) f32 -> (M, D) f32 via LN -> Linear -> LN."""
    M, P = tokens.shape
    D = params['w'].shape[0]

    tm = _round_up(min(block_tokens, _round_up(M, 8)), 8)
    Mp = _round_up(M, tm)
    if Mp != M:
        tokens = jnp.pad(tokens, ((0, Mp - M), (0, 0)))
    grid = (Mp // tm,)

    # Pre-transpose + pre-cast the projection weight once: lane-dense (P, D) bf16.
    w_t = params['w'].T.astype(jnp.bfloat16)

    args = (
        tokens,
        params['ln1_w'].reshape(1, P), params['ln1_b'].reshape(1, P),
        w_t, params['b'].reshape(1, D),
        params['ln2_w'].reshape(1, D), params['ln2_b'].reshape(1, D),
    )

    def const2d(i):
        return (0, 0)

    out = pl.pallas_call(
        patch_embed_kernel,
        out_shape=jax.ShapeDtypeStruct((Mp, D), jnp.float32),
        grid=grid,
        in_specs=[
            pl.BlockSpec((tm, P), lambda i: (i, 0)),   # activation tile (pipelined)
            pl.BlockSpec((1, P), const2d),             # ln1 weight
            pl.BlockSpec((1, P), const2d),             # ln1 bias
            pl.BlockSpec((P, D), const2d),             # projection weight (bf16)
            pl.BlockSpec((1, D), const2d),             # projection bias
            pl.BlockSpec((1, D), const2d),             # ln2 weight
            pl.BlockSpec((1, D), const2d),             # ln2 bias
        ],
        out_specs=pl.BlockSpec((tm, D), lambda i: (i, 0)),
        compiler_params=pltpu.CompilerParams(
            dimension_semantics=("parallel",),
            # Fits comfortably under v7x's 64 MiB physical VMEM while raising
            # the default scoped limit for larger production shapes.
            vmem_limit_bytes=48 * 1024 * 1024,
        ),
    )(*args)
    return out[:M]


def block2_forward(x, params, *, p1, p2, pf, block_tokens=256):
    """Forward pass of Block2.  x: (B, C, F, H, W) -> (B, N, dim)."""
    B, C, F_, H, W = x.shape
    f, h, w = F_ // pf, H // p1, W // p2
    P = p1 * p2 * pf * C
    N = f * h * w

    # Rearrange 'b c (f pf) (h p1) (w p2) -> b (f h w) (p1 p2 pf c)'
    xr = x.reshape(B, C, f, pf, h, p1, w, p2)
    xr = jnp.transpose(xr, (0, 2, 4, 6, 5, 7, 3, 1))    # b f h w p1 p2 pf c
    tokens = xr.reshape(B * N, P)

    out = pallas_patch_embed(tokens, params, block_tokens=block_tokens)
    return out.reshape(B, N, -1)


# ----------------------------------------------------------------------------
# Deterministic parameter initialization (shapes per the module __init__)
# ----------------------------------------------------------------------------
def init_params(key, patch_dim, dim):
    k1, k2, k3, k4, k5, k6 = jax.random.split(key, 6)
    s = 1.0 / math.sqrt(patch_dim)
    return dict(
        ln1_w=(1.0 + 0.1 * jax.random.normal(k1, (patch_dim,))).astype(jnp.float32),
        ln1_b=(0.1 * jax.random.normal(k2, (patch_dim,))).astype(jnp.float32),
        w=(s * jax.random.normal(k3, (dim, patch_dim))).astype(jnp.float32),  # torch Linear layout
        b=(0.1 * jax.random.normal(k4, (dim,))).astype(jnp.float32),
        ln2_w=(1.0 + 0.1 * jax.random.normal(k5, (dim,))).astype(jnp.float32),
        ln2_b=(0.1 * jax.random.normal(k6, (dim,))).astype(jnp.float32),
    )


# ----------------------------------------------------------------------------
# Pure-JAX reference (sanity check)
# ----------------------------------------------------------------------------
def ref_forward(x, params, *, p1, p2, pf, eps=1e-5):
    HP = jax.lax.Precision.HIGHEST
    B, C, F_, H, W = x.shape
    f, h, w = F_ // pf, H // p1, W // p2
    P = p1 * p2 * pf * C
    xr = x.reshape(B, C, f, pf, h, p1, w, p2)
    xr = jnp.transpose(xr, (0, 2, 4, 6, 5, 7, 3, 1))
    t = xr.reshape(B, f * h * w, P)

    def ln(v, wgt, bias):
        mu = jnp.mean(v, -1, keepdims=True)
        var = jnp.mean((v - mu) ** 2, -1, keepdims=True)
        return (v - mu) * jax.lax.rsqrt(var + eps) * wgt + bias

    t = ln(t, params['ln1_w'], params['ln1_b'])
    t = jnp.einsum('bnp,dp->bnd', t, params['w'], precision=HP) + params['b']
    return ln(t, params['ln2_w'], params['ln2_b'])


# ----------------------------------------------------------------------------
if __name__ == "__main__":
    # Small shapes consistent with Block2's constructor:
    #   image_size=16, image_patch_size=4, frames=16, frame_patch_size=4,
    #   channels=4, dim=128  ->  patch_dim=256, N=64 tokens/sample, 128 total.
    B, C = 2, 4
    image_size, p = 16, 4
    frames, pf = 16, 4
    dim = 128
    patch_dim = C * p * p * pf

    key = jax.random.PRNGKey(0)
    pkey, xkey = jax.random.split(key)
    params = init_params(pkey, patch_dim, dim)
    x = jax.random.normal(xkey, (B, C, frames, image_size, image_size),
                          jnp.float32)

    # block_tokens=64 -> grid=(2,) at these small shapes (exercises pipelining).
    fwd = jax.jit(functools.partial(block2_forward, p1=p, p2=p, pf=pf,
                                    block_tokens=64))
    out = jax.block_until_ready(fwd(x, params))

    N = (frames // pf) * (image_size // p) * (image_size // p)
    assert out.shape == (B, N, dim), out.shape

    ref = ref_forward(x, params, p1=p, p2=p, pf=pf)
    max_err = float(jnp.max(jnp.abs(out - ref)))
    assert jnp.allclose(out, ref, atol=2e-2, rtol=2e-2), (
        f"mismatch: max abs diff {max_err}")

    print("KERNEL_OK")
</pallas_src>

<mosaic_0001>
module attributes {stable_mosaic.version = 11 : i64} {
  func.func @patch_embed_kernel(%arg0: i32, %arg1: memref<64x256xf32, #tpu.memory_space<vmem>>, %arg2: memref<1x256xf32, #tpu.memory_space<vmem>>, %arg3: memref<1x256xf32, #tpu.memory_space<vmem>>, %arg4: memref<256x128xbf16, #tpu.memory_space<vmem>>, %arg5: memref<1x128xf32, #tpu.memory_space<vmem>>, %arg6: memref<1x128xf32, #tpu.memory_space<vmem>>, %arg7: memref<1x128xf32, #tpu.memory_space<vmem>>, %arg8: memref<64x128xf32, #tpu.memory_space<vmem>>) attributes {dimension_semantics = [#tpu.dimension_semantics<parallel>], iteration_bounds = array<i64: 2>, scalar_prefetch = 0 : i64, scratch_operands = 0 : i64, tpu.core_type = #tpu.core_type<tc>, window_params = [{transform_indices = @transform_0, window_bounds = array<i64: 64, 256>}, {pipeline_mode = #tpu.pipeline_mode<synchronous>, transform_indices = @transform_1, window_bounds = array<i64: 1, 256>}, {pipeline_mode = #tpu.pipeline_mode<synchronous>, transform_indices = @transform_2, window_bounds = array<i64: 1, 256>}, {pipeline_mode = #tpu.pipeline_mode<synchronous>, transform_indices = @transform_3, window_bounds = array<i64: 256, 128>}, {pipeline_mode = #tpu.pipeline_mode<synchronous>, transform_indices = @transform_4, window_bounds = array<i64: 1, 128>}, {pipeline_mode = #tpu.pipeline_mode<synchronous>, transform_indices = @transform_5, window_bounds = array<i64: 1, 128>}, {pipeline_mode = #tpu.pipeline_mode<synchronous>, transform_indices = @transform_6, window_bounds = array<i64: 1, 128>}, {transform_indices = @transform_7, window_bounds = array<i64: 64, 128>}]} {
    %c0 = arith.constant 0 : index
    %c0_0 = arith.constant 0 : index
    %0 = vector.load %arg1[%c0, %c0_0] : memref<64x256xf32, #tpu.memory_space<vmem>>, vector<64x256xf32>
    %cst = arith.constant dense<0.000000e+00> : vector<64xf32>
    %1 = vector.multi_reduction <add>, %0, %cst [1] : vector<64x256xf32> to vector<64xf32>
    %2 = vector.shape_cast %1 : vector<64xf32> to vector<64x1xf32>
    %cst_1 = arith.constant 2.560000e+02 : f32
    %3 = vector.broadcast %cst_1 : f32 to vector<64x1xf32>
    %4 = arith.divf %2, %3 : vector<64x1xf32>
    %5 = vector.broadcast %4 : vector<64x1xf32> to vector<64x256xf32>
    %6 = arith.subf %0, %5 : vector<64x256xf32>
    %7 = arith.mulf %6, %6 : vector<64x256xf32>
    %cst_2 = arith.constant dense<0.000000e+00> : vector<64xf32>
    %8 = vector.multi_reduction <add>, %7, %cst_2 [1] : vector<64x256xf32> to vector<64xf32>
    %9 = vector.shape_cast %8 : vector<64xf32> to vector<64x1xf32>
    %cst_3 = arith.constant 2.560000e+02 : f32
    %10 = vector.broadcast %cst_3 : f32 to vector<64x1xf32>
    %11 = arith.divf %9, %10 : vector<64x1xf32>
    %12 = vector.broadcast %4 : vector<64x1xf32> to vector<64x256xf32>
    %13 = arith.subf %0, %12 : vector<64x256xf32>
    %cst_4 = arith.constant 9.99999974E-6 : f32
    %14 = vector.broadcast %cst_4 : f32 to vector<64x1xf32>
    %15 = arith.addf %11, %14 : vector<64x1xf32>
    %16 = math.rsqrt %15 : vector<64x1xf32>
    %17 = vector.broadcast %16 : vector<64x1xf32> to vector<64x256xf32>
    %18 = arith.mulf %13, %17 : vector<64x256xf32>
    %c0_5 = arith.constant 0 : index
    %c0_6 = arith.constant 0 : index
    %19 = vector.load %arg2[%c0_5, %c0_6] : memref<1x256xf32, #tpu.memory_space<vmem>>, vector<1x256xf32>
    %20 = vector.broadcast %19 : vector<1x256xf32> to vector<64x256xf32>
    %21 = arith.mulf %18, %20 : vector<64x256xf32>
    %c0_7 = arith.constant 0 : index
    %c0_8 = arith.constant 0 : index
    %22 = vector.load %arg3[%c0_7, %c0_8] : memref<1x256xf32, #tpu.memory_space<vmem>>, vector<1x256xf32>
    %23 = vector.broadcast %22 : vector<1x256xf32> to vector<64x256xf32>
    %24 = arith.addf %21, %23 : vector<64x256xf32>
    %25 = arith.truncf %24 : vector<64x256xf32> to vector<64x256xbf16>
    %c0_9 = arith.constant 0 : index
    %c0_10 = arith.constant 0 : index
    %26 = vector.load %arg4[%c0_9, %c0_10] : memref<256x128xbf16, #tpu.memory_space<vmem>>, vector<256x128xbf16>
    %cst_11 = arith.constant dense<0.000000e+00> : vector<64x128xf32>
    %27 = tpu.matmul %25, %26, %cst_11 {dimension_numbers = #tpu.dot_dimension_numbers<[1], [0], [0], [1], [0, 0, 1, 1], [], []>} : vector<64x256xbf16>, vector<256x128xbf16>, vector<64x128xf32> -> vector<64x128xf32>
    %c0_12 = arith.constant 0 : index
    %c0_13 = arith.constant 0 : index
    %28 = vector.load %arg5[%c0_12, %c0_13] : memref<1x128xf32, #tpu.memory_space<vmem>>, vector<1x128xf32>
    %29 = vector.broadcast %28 : vector<1x128xf32> to vector<64x128xf32>
    %30 = arith.addf %27, %29 : vector<64x128xf32>
    %cst_14 = arith.constant dense<0.000000e+00> : vector<64xf32>
    %31 = vector.multi_reduction <add>, %30, %cst_14 [1] : vector<64x128xf32> to vector<64xf32>
    %32 = vector.shape_cast %31 : vector<64xf32> to vector<64x1xf32>
    %cst_15 = arith.constant 1.280000e+02 : f32
    %33 = vector.broadcast %cst_15 : f32 to vector<64x1xf32>
    %34 = arith.divf %32, %33 : vector<64x1xf32>
    %35 = vector.broadcast %34 : vector<64x1xf32> to vector<64x128xf32>
    %36 = arith.subf %30, %35 : vector<64x128xf32>
    %37 = arith.mulf %36, %36 : vector<64x128xf32>
    %cst_16 = arith.constant dense<0.000000e+00> : vector<64xf32>
    %38 = vector.multi_reduction <add>, %37, %cst_16 [1] : vector<64x128xf32> to vector<64xf32>
    %39 = vector.shape_cast %38 : vector<64xf32> to vector<64x1xf32>
    %cst_17 = arith.constant 1.280000e+02 : f32
    %40 = vector.broadcast %cst_17 : f32 to vector<64x1xf32>
    %41 = arith.divf %39, %40 : vector<64x1xf32>
    %42 = vector.broadcast %34 : vector<64x1xf32> to vector<64x128xf32>
    %43 = arith.subf %30, %42 : vector<64x128xf32>
    %cst_18 = arith.constant 9.99999974E-6 : f32
    %44 = vector.broadcast %cst_18 : f32 to vector<64x1xf32>
    %45 = arith.addf %41, %44 : vector<64x1xf32>
    %46 = math.rsqrt %45 : vector<64x1xf32>
    %47 = vector.broadcast %46 : vector<64x1xf32> to vector<64x128xf32>
    %48 = arith.mulf %43, %47 : vector<64x128xf32>
    %c0_19 = arith.constant 0 : index
    %c0_20 = arith.constant 0 : index
    %49 = vector.load %arg6[%c0_19, %c0_20] : memref<1x128xf32, #tpu.memory_space<vmem>>, vector<1x128xf32>
    %50 = vector.broadcast %49 : vector<1x128xf32> to vector<64x128xf32>
    %51 = arith.mulf %48, %50 : vector<64x128xf32>
    %c0_21 = arith.constant 0 : index
    %c0_22 = arith.constant 0 : index
    %52 = vector.load %arg7[%c0_21, %c0_22] : memref<1x128xf32, #tpu.memory_space<vmem>>, vector<1x128xf32>
    %53 = vector.broadcast %52 : vector<1x128xf32> to vector<64x128xf32>
    %54 = arith.addf %51, %53 : vector<64x128xf32>
    %c0_23 = arith.constant 0 : index
    %c0_24 = arith.constant 0 : index
    %55 = vector.load %arg8[%c0_23, %c0_24] : memref<64x128xf32, #tpu.memory_space<vmem>>, vector<64x128xf32>
    tpu.vector_store %arg8[%c0_23, %c0_24], %54 {strides = array<i32>} : memref<64x128xf32, #tpu.memory_space<vmem>>, vector<64x128xf32>,
    return
  }
  func.func @transform_0(%arg0: i32) -> (i32, i32) {
    %c0_i32 = arith.constant 0 : i32
    %c0_i32_0 = arith.constant 0 : i32
    return %arg0, %c0_i32 : i32, i32
  }
  func.func @transform_1(%arg0: i32) -> (i32, i32) {
    %c0_i32 = arith.constant 0 : i32
    %c0_i32_0 = arith.constant 0 : i32
    %c0_i32_1 = arith.constant 0 : i32
    return %c0_i32, %c0_i32_0 : i32, i32
  }
  func.func @transform_2(%arg0: i32) -> (i32, i32) {
    %c0_i32 = arith.constant 0 : i32
    %c0_i32_0 = arith.constant 0 : i32
    %c0_i32_1 = arith.constant 0 : i32
    return %c0_i32, %c0_i32_0 : i32, i32
  }
  func.func @transform_3(%arg0: i32) -> (i32, i32) {
    %c0_i32 = arith.constant 0 : i32
    %c0_i32_0 = arith.constant 0 : i32
    %c0_i32_1 = arith.constant 0 : i32
    return %c0_i32, %c0_i32_0 : i32, i32
  }
  func.func @transform_4(%arg0: i32) -> (i32, i32) {
    %c0_i32 = arith.constant 0 : i32
    %c0_i32_0 = arith.constant 0 : i32
    %c0_i32_1 = arith.constant 0 : i32
    return %c0_i32, %c0_i32_0 : i32, i32
  }
  func.func @transform_5(%arg0: i32) -> (i32, i32) {
    %c0_i32 = arith.constant 0 : i32
    %c0_i32_0 = arith.constant 0 : i32
    %c0_i32_1 = arith.constant 0 : i32
    return %c0_i32, %c0_i32_0 : i32, i32
  }
  func.func @transform_6(%arg0: i32) -> (i32, i32) {
    %c0_i32 = arith.constant 0 : i32
    %c0_i32_0 = arith.constant 0 : i32
    %c0_i32_1 = arith.constant 0 : i32
    return %c0_i32, %c0_i32_0 : i32, i32
  }
  func.func @transform_7(%arg0: i32) -> (i32, i32) {
    %c0_i32 = arith.constant 0 : i32
    %c0_i32_0 = arith.constant 0 : i32
    return %arg0, %c0_i32 : i32, i32
  }
}

</mosaic_0001>

<bundles_post_ra>
// kernel: block2_forward.1
= control target key start
LH: loop header
LB: loop body
LE: loop exit
PB: predicated region body
PF: predicated region fallthrough
CT: control target
= control target key end

     0   :  { %12 = vsyncpa [#allocation3], 0  ;;  %s1525_s0 = inlined_call_operand.vmem [shape: f32[128,256], index: 0, kind: input, shape index: {}]   ;;  %s1526_s1 = inlined_call_operand.vmem [shape: f32[1,256], index: 1, kind: input, shape index: {}]   ;;  %s1527_s2 = inlined_call_operand.vmem [shape: f32[1,256], index: 2, kind: input, shape index: {}]   ;;  %s1528_s3 = inlined_call_operand.vmem [shape: bf16[256,128], index: 3, kind: input, shape index: {}]   ;;  %s1529_s4 = inlined_call_operand.vmem [shape: f32[1,128], index: 4, kind: input, shape index: {}]   ;;  %s1530_s5 = inlined_call_operand.vmem [shape: f32[1,128], index: 5, kind: input, shape index: {}]   ;;  %s1531_s6 = inlined_call_operand.vmem [shape: f32[1,128], index: 6, kind: input, shape index: {}]   ;;  %s1532_s7 = inlined_call_operand.hbm [shape: f32[128,128], index: 7, kind: output, shape index: {}]  }
   0x1   :  { %14 = vsyncpa [#allocation3 + $0x1], 0  ;;  %s1180_s24 = smov 0   ;;  %s1182_s25 = smov 0  }
   0x2   :  { %s1184_s26 = smov 0   ;;  %s1186_s27 = smov 0  }
   0x3 LB: > { %s1201_s28 = sadd.s32 4294967295, %s1135_s27   ;;  %s896_s29 = sadd.s32 4294967294, %s1135_s27   ;;  %s1135_s27 = sphi %s1186_s27, %s1538_s27   ;;  %s1131_s26 = sphi %s1184_s26, %s1537_s26   ;;  %s1127_s25 = sphi %s1182_s25, %s1536_s25   ;;  %s1123_s24 = sphi %s1180_s24, %s1535_s24  }
   0x4   : > { %s1205_s30 = sadd.s32 1, %s1135_s27   ;;  %s179_s8 = sadd.s32 1, %s1131_s26 }
   0x5   : > { %s176_s9 = ssub.s32 %s1135_s27, %s1205_s30  ;;  %p189_p0 = scmp.ne.s32.totalorder %s1131_s26, %s1127_s25 }
   0x6   : > { %p177_p1 = scmp.eq.s32.totalorder %s176_s9, 0  ;;  %p190_p2 = scmp.eq.s32.totalorder %s1201_s28, 1 }
   0x7   : > { %p195_p3 = scmp.ne.s32.totalorder %s1127_s25, %s1123_s24  ;;  %p196_p4 = scmp.eq.s32.totalorder %s896_s29, 1 }
   0x8   : > { %s1216_s10 = scalar_select %p177_p1, %s1131_s26, %s179_s8  }
   0x9   : > { %p1218_p5 = por %p190_p2, %p189_p0  ;;  %p1222_p6 = por %p196_p4, %p195_p3 }
   0xa   : > { %p899_p7 = scmp.ge.s32.totalorder %s1135_s27, 1  ;;  %p242_p8 = scmp.lt.s32.totalorder %s1135_s27, 3 }
   0xc   : > { %p243_p9 = pnand %p899_p7, %p242_p8 }
   0xd   : > { %s901_s13 = sshll.u32 (!%p243_p9), %s1201_s28, 3  ;;  %s929_s21 = sshll.u32 (!%p243_p9), %s1201_s28, 10 }
   0xe   : > { %246 = sbr.rel (%p243_p9) target bundleno = 875 (0x36b), region = 48  ;;  %p276_p10 = scmp.lt.s32.totalorder (!%p243_p9), %s901_s13, 15 }
   0xf   : > { %s1478_s8 = scalar_lea.hbm (!%p243_p9), %s1532_s7, %s929_s21 }
  0x13   : > { %s1540_s13 = smov (!%p276_p10, %s901_s13), 15  ;;  %v1027_v24 = vld [vmem:[%s1528_s3 + $0x78] sm:$0xff]  }
  0x14   : > { %s928_s14 = sshll.u32 %s1540_s13, 4  ;;  %930 = vmatprep.subr.bf16.mxu0 %v1027_v24  ;;  %970 = vmatprep.subr.bf16.mxu1 %v1027_v24  ;;  %v1035_v24 = vld [vmem:[%s1528_s3 + $0x58] sm:$0xff]   ;;  %s1137_s13 = smov [#allocation2]  }
  0x15   : > { %s280_s17 = scalar_lea.vmem %s1525_s0, %s928_s14  ;;  %s272_s14 = sand.u32 1, %s1127_s25  }
  0x16   : > { %v284_v0 = vld [vmem:[%s280_s17] sm:$0xff]  ;;  %v285_v1 = vld [vmem:[%s280_s17 + $0x8] sm:$0xff]  ;;  %v286_v5 = vld [vmem:[%s280_s17 + $0x10] sm:$0xff]  ;;  %s1485_s9 = scalar_lea.sflag [#allocation3], %s272_s14  ;;  %s1079_s15 = sshll.u32 %s1137_s13, 4  ;;  %s1080_s15 = int_to_ptr.vmem [resolvable:$false] %s1079_s15 }
  0x17   : > { %v292_v2 = vld [vmem:[%s280_s17 + $0x40] sm:$0xff]  ;;  %v300_v3 = vadd.f32 %v285_v1, %v284_v0  ;;  %v293_v4 = vld [vmem:[%s280_s17 + $0x48] sm:$0xff]  ;;  %v287_v6 = vld [vmem:[%s280_s17 + $0x18] sm:$0xff]  ;;  %s1081_s16 = scalar_lea.vmem %s1080_s15, 2048 }
  0x18   : > { %v312_v7 = vadd.f32 %v293_v4, %v292_v2  ;;  %v294_v8 = vld [vmem:[%s280_s17 + $0x50] sm:$0xff]  ;;  %v295_v9 = vld [vmem:[%s280_s17 + $0x58] sm:$0xff]  ;;  %v303_v10 = vadd.f32 %v287_v6, %v286_v5  ;;  %v288_v12 = vld [vmem:[%s280_s17 + $0x20] sm:$0xff] }
  0x19   : > { %301 = vadd.xlane.f32.xlu0 %v300_v3  ;;  %v315_v11 = vadd.f32 %v295_v9, %v294_v8  ;;  %v289_v13 = vld [vmem:[%s280_s17 + $0x28] sm:$0xff]  ;;  %v290_v14 = vld [vmem:[%s280_s17 + $0x30] sm:$0xff]  ;;  %v291_v15 = vld [vmem:[%s280_s17 + $0x38] sm:$0xff] }
  0x1a   : > { %313 = vadd.xlane.f32.xlu1 %v312_v7  ;;  %v1232_v16 = vld [vmem:[%s280_s17 + $0x60] sm:$0xff]  ;;  %v1234_v17 = vld [vmem:[%s280_s17 + $0x68] sm:$0xff]  ;;  %v306_v18 = vadd.f32 %v289_v13, %v288_v12  ;;  %v1236_v19 = vld [vmem:[%s280_s17 + $0x70] sm:$0xff]  ;;  %v309_v21 = vadd.f32 %v291_v15, %v290_v14 }
  0x1b   : > { %v1238_v20 = vld [vmem:[%s280_s17 + $0x78] sm:$0xff]  ;;  %v318_v22 = vadd.f32 %v1234_v17, %v1232_v16  ;;  %s900_s17 = sshll.u32 %s272_s14, 6 }
  0x1c   : > { %v321_v23 = vadd.f32 %v1238_v20, %v1236_v19  ;;  %s1459_s20 = scalar_lea.vmem [#allocation2], %s900_s17 }
  0x1d   : > { %304 = vadd.xlane.f32.xlu0 %v303_v10  ;;  %s834_s22 = sshll.u32 %s1459_s20, 4  ;;  %s1480_s22 = int_to_ptr.vmem [resolvable:$true] %s834_s22 }
  0x1e   : > { %316 = vadd.xlane.f32.xlu1 %v315_v11  ;;  %s1075_s28 = scalar_lea.vmem %s1480_s22, 1024  ;;  %p1082_p0 = scmp.lt.s32.totalorder %s1480_s22, %s1080_s15 }
  0x1f   : > { %p1076_p11 = scmp.ne.s32.totalorder %s1480_s22, %s1075_s28  ;;  %p1083_p1 = scmp.lt.s32.totalorder %s1081_s16, %s1075_s28 }
  0x21   : > { %307 = vadd.xlane.f32.xlu0 %v306_v18  ;;  %p1077_p12 = pnand %p1076_p11, %p1218_p5  ;;  %p1084_p2 = por %p1083_p1, %p1082_p0 }
  0x22   : > { %310 = vadd.xlane.f32.xlu1 %v309_v21  ;;  %v1032_v21 = vld [vmem:[%s1528_s3 + $0x28] sm:$0xff]  }
  0x23   : > { %p1078_p13 = pneg %p1077_p12 }
  0x25   : > { %319 = vadd.xlane.f32.xlu0 %v318_v22  ;;  %v1033_v22 = vld [vmem:[%s1528_s3 + $0x60] sm:$0xff]   ;;  %p1085_p3 = pnand %p1084_p2, %p1078_p13 }
  0x26   : > { %322 = vadd.xlane.f32.xlu1 %v321_v23  ;;  %v1034_v23 = vld [vmem:[%s1528_s3 + $0x20] sm:$0xff]  }
  0xa2   : > { %v302_v25 = vpop.xlane.xlu0 %301 }
  0xa3   : > { %v325_v26 = vmul.f32 0.00390625, %v302_v25  ;;  %v314_v27 = vpop.xlane.xlu1 %313  ;;  %v1036_v25 = vld [vmem:[%s1528_s3 + $0x18] sm:$0xff]  }
  0xa4   : > { %v329_v28 = vmul.f32 0.00390625, %v314_v27  ;;  %v1038_v27 = vld [vmem:[%s1528_s3 + $0x10] sm:$0xff]  }
  0xa5   : > { %v1247_v29 = vsub.f32 %v284_v0, %v325_v26  ;;  %v1249_v30 = vsub.f32 %v285_v1, %v325_v26  ;;  %v1037_v26 = vld [vmem:[%s1528_s3 + $0x50] sm:$0xff]  }
  0xa6   : > { %v1251_v31 = vsub.f32 %v292_v2, %v329_v28  ;;  %v1253_v32 = vsub.f32 %v293_v4, %v329_v28  ;;  %v305_v33 = vpop.xlane.xlu0 %304  ;;  %v1039_v28 = vld [vmem:[%s1528_s3 + $0x48] sm:$0xff]  }
  0xa7   : > { %v326_v34 = vmul.f32 0.00390625, %v305_v33  ;;  %v317_v35 = vpop.xlane.xlu1 %316  ;;  %v349_v36 = vmul.f32 %v1247_v29, %v1247_v29  ;;  %v350_v37 = vmul.f32 %v1249_v30, %v1249_v30  ;;  %v1040_v33 = vld [vmem:[%s1528_s3 + $0x8] sm:$0xff]  }
  0xa8   : > { %v330_v38 = vmul.f32 0.00390625, %v317_v35  ;;  %v357_v39 = vmul.f32 %v1251_v31, %v1251_v31  ;;  %v358_v40 = vmul.f32 %v1253_v32, %v1253_v32  ;;  %v1042_v35 = vld [vmem:[%s1528_s3] sm:$0xff]  }
  0xa9   : > { %v1263_v41 = vsub.f32 %v286_v5, %v326_v34  ;;  %v1265_v42 = vsub.f32 %v287_v6, %v326_v34  ;;  %v365_v43 = vadd.f32 %v350_v37, %v349_v36  ;;  %v1041_v34 = vld [vmem:[%s1528_s3 + $0x40] sm:$0xff]  }
  0xaa   : > { %v1267_v44 = vsub.f32 %v294_v8, %v330_v38  ;;  %v1269_v45 = vsub.f32 %v295_v9, %v330_v38  ;;  %v308_v46 = vpop.xlane.xlu0 %307  ;;  %v377_v49 = vadd.f32 %v358_v40, %v357_v39 }
  0xab   : > { %v327_v47 = vmul.f32 0.00390625, %v308_v46  ;;  %366 = vadd.xlane.f32.xlu0 %v365_v43  ;;  %v311_v48 = vpop.xlane.xlu1 %310  ;;  %v351_v50 = vmul.f32 %v1263_v41, %v1263_v41  ;;  %v352_v51 = vmul.f32 %v1265_v42, %v1265_v42 }
  0xac   : > { %v328_v52 = vmul.f32 0.00390625, %v311_v48  ;;  %v359_v53 = vmul.f32 %v1267_v44, %v1267_v44  ;;  %v360_v54 = vmul.f32 %v1269_v45, %v1269_v45 }
  0xad   : > { %v1279_v55 = vsub.f32 %v288_v12, %v327_v47  ;;  %v1281_v56 = vsub.f32 %v289_v13, %v327_v47  ;;  %v368_v57 = vadd.f32 %v352_v51, %v351_v50  ;;  %v1028_v13 = vld [vmem:[%s1528_s3 + $0x38] sm:$0xff]   ;;  %v431_v47 = vlaneseq }
  0xae   : > { %v1283_v58 = vsub.f32 %v290_v14, %v328_v52  ;;  %v1285_v59 = vsub.f32 %v291_v15, %v328_v52  ;;  %v320_v60 = vpop.xlane.xlu0 %319  ;;  %v380_v63 = vadd.f32 %v360_v54, %v359_v53  ;;  %931 = vmatpush3.bf16.msra.mxu0 %v1028_v13  ;;  %978 = vmatpush3.bf16.msra.mxu1 %v1028_v13 }
  0xaf   : > { %v331_v61 = vmul.f32 0.00390625, %v320_v60  ;;  %378 = vadd.xlane.f32.xlu0 %v377_v49  ;;  %369 = vadd.xlane.f32.xlu1 %v368_v57  ;;  %v323_v62 = vpop.xlane.xlu1 %322  ;;  %v353_v0 = vmul.f32 %v1279_v55, %v1279_v55  ;;  %v354_v1 = vmul.f32 %v1281_v56, %v1281_v56  ;;  %v432_v54 = vshrl.u32 %v431_v47, 7 }
  0xb0   : > { %v332_v2 = vmul.f32 0.00390625, %v323_v62  ;;  %v355_v3 = vmul.f32 %v1283_v58, %v1283_v58  ;;  %v356_v4 = vmul.f32 %v1285_v59, %v1285_v59 }
  0xb1   : > { %v1296_v5 = vsub.f32 %v1232_v16, %v331_v61  ;;  %v1299_v6 = vsub.f32 %v1234_v17, %v331_v61  ;;  %v371_v7 = vadd.f32 %v354_v1, %v353_v0  ;;  %v1029_v17 = vld [vmem:[%s1528_s3 + $0x70] sm:$0xff]   ;;  %v433_v1 = vsub.s32 0, %v432_v54 }
  0xb2   : > { %v1302_v8 = vsub.f32 %v1236_v19, %v332_v2  ;;  %v1305_v9 = vsub.f32 %v1238_v20, %v332_v2  ;;  %v374_v10 = vadd.f32 %v356_v4, %v355_v3  ;;  %932 = vmatprep.subr.bf16.mxu0 %v1029_v17  ;;  %v1030_v19 = vld [vmem:[%s1528_s3 + $0x30] sm:$0xff]   ;;  %971 = vmatprep.subr.bf16.mxu1 %v1029_v17  ;;  %v1031_v20 = vld [vmem:[%s1528_s3 + $0x68] sm:$0xff]   ;;  %v437_v2 = vsub.s32 1, %v432_v54  ;;  %v457_v17 = vld [vmem:[%s1527_s2] sm:$0x3] }
  0xb3   : > { %381 = vadd.xlane.f32.xlu1 %v380_v63  ;;  %372 = vadd.xlane.f32.xlu0 %v371_v7  ;;  %v361_v11 = vmul.f32 %v1296_v5, %v1296_v5  ;;  %v362_v12 = vmul.f32 %v1299_v6, %v1299_v6  ;;  %v429_v7 = vld [vmem:[%s1526_s1] sm:$0x3] }
  0xb4   : > { %v363_v14 = vmul.f32 %v1302_v8, %v1302_v8  ;;  %v364_v15 = vmul.f32 %v1305_v9, %v1305_v9  ;;  %933 = vmatpush3.bf16.msra.mxu0 %v1030_v19  ;;  %979 = vmatpush3.bf16.msra.mxu1 %v1030_v19  ;;  %v1363_v13 = vrot.slane %v429_v7, %v433_v1 }
  0xb5   : > { %v383_v16 = vadd.f32 %v362_v12, %v361_v11  ;;  %934 = vmatprep.subr.bf16.mxu0 %v1031_v20  ;;  %972 = vmatprep.subr.bf16.mxu1 %v1031_v20 }
  0xb6   : > { %v386_v18 = vadd.f32 %v364_v15, %v363_v14  ;;  %v1365_v14 = vrot.slane %v429_v7, %v437_v2 }
  0xb7   : > { %375 = vadd.xlane.f32.xlu1 %v374_v10  ;;  %384 = vadd.xlane.f32.xlu0 %v383_v16 }
  0xb8   : > { %935 = vmatpush3.bf16.msra.mxu0 %v1032_v21  ;;  %980 = vmatpush3.bf16.msra.mxu1 %v1032_v21  ;;  %v1373_v21 = vrot.slane %v457_v17, %v433_v1 }
  0xb9   : > { %936 = vmatprep.subr.bf16.mxu0 %v1033_v22  ;;  %973 = vmatprep.subr.bf16.mxu1 %v1033_v22  ;;  %v466_v22 = vrot.slane %v457_v17, %v437_v2 }
  0xbb   : > { %387 = vadd.xlane.f32.xlu1 %v386_v18 }
  0xbc   : > { %937 = vmatpush3.bf16.msra.mxu0 %v1034_v23  ;;  %981 = vmatpush3.bf16.msra.mxu1 %v1034_v23 }
  0xbd   : > { %938 = vmatprep.subr.bf16.mxu0 %v1035_v24  ;;  %974 = vmatprep.subr.bf16.mxu1 %v1035_v24 }
  0xc0   : > { %939 = vmatpush3.bf16.msra.mxu0 %v1036_v25  ;;  %982 = vmatpush3.bf16.msra.mxu1 %v1036_v25 }
  0xc1   : > { %940 = vmatprep.subr.bf16.mxu0 %v1037_v26  ;;  %975 = vmatprep.subr.bf16.mxu1 %v1037_v26 }
  0xc4   : > { %941 = vmatpush3.bf16.msra.mxu0 %v1038_v27  ;;  %983 = vmatpush3.bf16.msra.mxu1 %v1038_v27 }
  0xc5   : > { %942 = vmatprep.subr.bf16.mxu0 %v1039_v28  ;;  %976 = vmatprep.subr.bf16.mxu1 %v1039_v28 }
  0xc8   : > { %943 = vmatpush3.bf16.msra.mxu0 %v1040_v33  ;;  %984 = vmatpush3.bf16.msra.mxu1 %v1040_v33 }
  0xc9   : > { %944 = vmatprep.subr.bf16.mxu0 %v1041_v34  ;;  %977 = vmatprep.subr.bf16.mxu1 %v1041_v34 }
  0xcc   : > { %945 = vmatpush3.bf16.msra.mxu0 %v1042_v35  ;;  %985 = vmatpush3.bf16.msra.mxu1 %v1042_v35 }
 0x134   : > { %v367_v36 = vpop.xlane.xlu0 %366 }
 0x135   : > { %v389_v37 = vmul.f32 0.00390625, %v367_v36 }
 0x137   : > { %v397_v38 = vadd.f32 1e-05, %v389_v37 }
 0x138   : > { %v370_v39 = vpop.xlane.xlu1 %369  ;;  %v379_v40 = vpop.xlane.xlu0 %378 }
 0x139   : > { %1043 = vrsqrt.f32 %v397_v38  ;;  %v390_v43 = vmul.f32 0.00390625, %v370_v39  ;;  %v393_v46 = vmul.f32 0.00390625, %v379_v40 }
 0x13b   : > { %v398_v48 = vadd.f32 1e-05, %v390_v43  ;;  %v401_v49 = vadd.f32 1e-05, %v393_v46 }
 0x13c   : > { %v382_v50 = vpop.xlane.xlu1 %381  ;;  %v373_v51 = vpop.xlane.xlu0 %372 }
 0x13d   : > { %1045 = vrsqrt.f32 %v398_v48  ;;  %v394_v52 = vmul.f32 0.00390625, %v382_v50  ;;  %v391_v53 = vmul.f32 0.00390625, %v373_v51 }
 0x13e   : > { %1047 = vrsqrt.f32 %v401_v49 }
 0x13f   : > { %v402_v57 = vadd.f32 1e-05, %v394_v52  ;;  %v399_v60 = vadd.f32 1e-05, %v391_v53 }
 0x140   : > { %v376_v61 = vpop.xlane.xlu1 %375  ;;  %v385_v62 = vpop.xlane.xlu0 %384 }
 0x141   : > { %1049 = vrsqrt.f32 %v402_v57  ;;  %v392_v63 = vmul.f32 0.00390625, %v376_v61  ;;  %v395_v0 = vmul.f32 0.00390625, %v385_v62 }
 0x142   : > { %1051 = vrsqrt.f32 %v399_v60 }
 0x143   : > { %v400_v3 = vadd.f32 1e-05, %v392_v63  ;;  %v403_v4 = vadd.f32 1e-05, %v395_v0 }
 0x144   : > { %v388_v10 = vpop.xlane.xlu1 %387 }
 0x145   : > { %1053 = vrsqrt.f32 %v400_v3  ;;  %v396_v11 = vmul.f32 0.00390625, %v388_v10 }
 0x146   : > { %v1044_v12 = vpop.eup %1043  ;;  %1055 = vrsqrt.f32 %v403_v4 }
 0x147   : > { %v404_v15 = vadd.f32 1e-05, %v396_v11  ;;  %v414_v16 = vmul.f32 %v1044_v12, %v1249_v30  ;;  %v413_v18 = vmul.f32 %v1044_v12, %v1247_v29 }
 0x149   : > { %1057 = vrsqrt.f32 %v404_v15  ;;  %v442_v20 = vmul.f32 %v1365_v14, %v414_v16  ;;  %v441_v23 = vmul.f32 %v1363_v13, %v413_v18 }
 0x14a   : > { %v1046_v19 = vpop.eup %1045 }
 0x14b   : > { %v1048_v24 = vpop.eup %1047  ;;  %v416_v25 = vmul.f32 %v1046_v19, %v1265_v42  ;;  %v415_v30 = vmul.f32 %v1046_v19, %v1263_v41  ;;  %v470_v34 = vadd.f32 %v466_v22, %v442_v20  ;;  %v469_v35 = vadd.f32 %v1373_v21, %v441_v23 }
 0x14c   : > { %v422_v26 = vmul.f32 %v1048_v24, %v1253_v32  ;;  %v421_v27 = vmul.f32 %v1048_v24, %v1251_v31 }
 0x14d   : > { %v444_v29 = vmul.f32 %v1365_v14, %v416_v25  ;;  %v443_v28 = vmul.f32 %v1363_v13, %v415_v30 }
 0x14e   : > { %v1050_v33 = vpop.eup %1049  ;;  %v450_v36 = vmul.f32 %v1365_v14, %v422_v26  ;;  %v449_v37 = vmul.f32 %v1363_v13, %v421_v27 }
 0x14f   : > { %v1052_v38 = vpop.eup %1051  ;;  %v472_v42 = vadd.f32 %v466_v22, %v444_v29  ;;  %v471_v41 = vadd.f32 %v1373_v21, %v443_v28  ;;  %v424_v32 = vmul.f32 %v1050_v33, %v1269_v45  ;;  %v423_v31 = vmul.f32 %v1050_v33, %v1267_v44 }
 0x150   : > { %v418_v39 = vmul.f32 %v1052_v38, %v1281_v56  ;;  %v417_v40 = vmul.f32 %v1052_v38, %v1279_v55  ;;  %v478_v50 = vadd.f32 %v466_v22, %v450_v36  ;;  %v477_v51 = vadd.f32 %v1373_v21, %v449_v37 }
 0x151   : > { %v486_v43 = vpack.c.bf16 %v472_v42, %v470_v34  ;;  %v485_v46 = vpack.c.bf16 %v471_v41, %v469_v35  ;;  %v452_v47 = vmul.f32 %v1365_v14, %v424_v32  ;;  %v451_v48 = vmul.f32 %v1363_v13, %v423_v31 }
 0x152   : > { %v1054_v49 = vpop.eup %1053  ;;  %v446_v52 = vmul.f32 %v1365_v14, %v418_v39  ;;  %v445_v45 = vmul.f32 %v1363_v13, %v417_v40 }
 0x153   : > { %v1056_v53 = vpop.eup %1055  ;;  %660 = vmatprep.mubr.bf16.mxu0 %v486_v43  ;;  %v480_v44 = vadd.f32 %v466_v22, %v452_v47  ;;  %v479_v56 = vadd.f32 %v1373_v21, %v451_v48  ;;  %v420_v55 = vmul.f32 %v1054_v49, %v1285_v59  ;;  %v419_v54 = vmul.f32 %v1054_v49, %v1283_v58 }
 0x154   : > { %661 = vmatmul.mubr.bf16.vlgmr.msra.gmra.mxu0 %v485_v46  ;;  %v426_v57 = vmul.f32 %v1056_v53, %v1299_v6  ;;  %v425_v60 = vmul.f32 %v1056_v53, %v1296_v5  ;;  %v474_v2 = vadd.f32 %v466_v22, %v446_v52  ;;  %v473_v3 = vadd.f32 %v1373_v21, %v445_v45 }
 0x155   : > { %v490_v61 = vpack.c.bf16 %v480_v44, %v478_v50  ;;  %v489_v62 = vpack.c.bf16 %v479_v56, %v477_v51  ;;  %v448_v63 = vmul.f32 %v1365_v14, %v420_v55  ;;  %v447_v0 = vmul.f32 %v1363_v13, %v419_v54 }
 0x156   : > { %v1058_v1 = vpop.eup %1057  ;;  %v454_v4 = vmul.f32 %v1365_v14, %v426_v57  ;;  %v453_v59 = vmul.f32 %v1363_v13, %v425_v60 }
 0x157   : > { %676 = vmatprep.mubr.bf16.mxu1 %v490_v61  ;;  %v476_v58 = vadd.f32 %v466_v22, %v448_v63  ;;  %v475_v6 = vadd.f32 %v1373_v21, %v447_v0  ;;  %v428_v5 = vmul.f32 %v1058_v1, %v1305_v9  ;;  %v427_v7 = vmul.f32 %v1058_v1, %v1302_v8 }
 0x158   : > { %677 = vmatmul.mubr.bf16.vlgmr.msra.gmra.mxu1 %v489_v62  ;;  %v482_v16 = vadd.f32 %v466_v22, %v454_v4  ;;  %v481_v18 = vadd.f32 %v1373_v21, %v453_v59 }
 0x159   : > { %v488_v10 = vpack.c.bf16 %v476_v58, %v474_v2  ;;  %v487_v11 = vpack.c.bf16 %v475_v6, %v473_v3  ;;  %v456_v12 = vmul.f32 %v1365_v14, %v428_v5  ;;  %v455_v15 = vmul.f32 %v1363_v13, %v427_v7  ;;  %v904_v14 = vld [vmem:[%s1529_s4] ss:$0 sm:$0xff] }
 0x15b   : > { %668 = vmatprep.mubr.bf16.mxu0 %v488_v10  ;;  %v484_v17 = vadd.f32 %v466_v22, %v456_v12  ;;  %v483_v19 = vadd.f32 %v1373_v21, %v455_v15 }
 0x15c   : > { %669 = vmatmul.mubr.bf16.gmra.mxu0 %v487_v11 }
 0x15d   : > { %v492_v20 = vpack.c.bf16 %v484_v17, %v482_v16  ;;  %v491_v23 = vpack.c.bf16 %v483_v19, %v481_v18 }
 0x15f   : > { %684 = vmatprep.mubr.bf16.mxu1 %v492_v20 }
 0x160   : > { %685 = vmatmul.mubr.bf16.gmra.mxu1 %v491_v23 }
 0x214   : > { %v946_v8 = vpop.f32.mrf.mxu0 }
 0x216   : > { %v947_v9 = vpop.f32.mrf.mxu0 }
 0x217   : > { %v948_v24 = vadd.f32 %v947_v9, %v946_v8 }
 0x218   : > { %v949_v13 = vpop.f32.mrf.mxu0  ;;  %v958_v25 = vpop.f32.mrf.mxu1 }
 0x219   : > { %v663_v30 = vadd.f32 %v948_v24, %v904_v14 }
 0x21a   : > { %v950_v22 = vpop.f32.mrf.mxu0  ;;  %v959_v26 = vpop.f32.mrf.mxu1 }
 0x21b   : > { %v951_v27 = vadd.f32 %v950_v22, %v949_v13  ;;  %v960_v29 = vadd.f32 %v959_v26, %v958_v25  ;;  %693 = vadd.xlane.f32.xlu0 %v663_v30 }
 0x21c   : > { %v952_v21 = vpop.f32.mrf.mxu0  ;;  %v961_v28 = vpop.f32.mrf.mxu1 }
 0x21d   : > { %v666_v33 = vadd.f32 %v951_v27, %v904_v14  ;;  %v679_v34 = vadd.f32 %v960_v29, %v904_v14 }
 0x21e   : > { %v953_v35 = vpop.f32.mrf.mxu0  ;;  %v962_v36 = vpop.f32.mrf.mxu1 }
 0x21f   : > { %v954_v37 = vadd.f32 %v953_v35, %v952_v21  ;;  %v963_v38 = vadd.f32 %v962_v36, %v961_v28  ;;  %695 = vadd.xlane.f32.xlu1 %v666_v33  ;;  %701 = vadd.xlane.f32.xlu0 %v679_v34 }
 0x220   : > { %v955_v42 = vpop.f32.mrf.mxu0  ;;  %v964_v41 = vpop.f32.mrf.mxu1 }
 0x221   : > { %v682_v32 = vadd.f32 %v963_v38, %v904_v14  ;;  %v671_v31 = vadd.f32 %v954_v37, %v904_v14 }
 0x222   : > { %v956_v39 = vpop.f32.mrf.mxu0  ;;  %v965_v40 = vpop.f32.mrf.mxu1 }
 0x223   : > { %v957_v43 = vadd.f32 %v956_v39, %v955_v42  ;;  %v966_v46 = vadd.f32 %v965_v40, %v964_v41  ;;  %703 = vadd.xlane.f32.xlu1 %v682_v32  ;;  %697 = vadd.xlane.f32.xlu0 %v671_v31 }
 0x224   : > { %v967_v47 = vpop.f32.mrf.mxu1 }
 0x225   : > { %v674_v48 = vadd.f32 %v957_v43, %v904_v14  ;;  %v687_v49 = vadd.f32 %v966_v46, %v904_v14  ;;  %v921_v43 = vld [vmem:[%s1530_s5] ss:$0 sm:$0xff] }
 0x226   : > { %v968_v50 = vpop.f32.mrf.mxu1 }
 0x227   : > { %v969_v51 = vadd.f32 %v968_v50, %v967_v47  ;;  %699 = vadd.xlane.f32.xlu1 %v674_v48  ;;  %705 = vadd.xlane.f32.xlu0 %v687_v49 }
 0x229   : > { %v690_v52 = vadd.f32 %v969_v51, %v904_v14 }
 0x22b   : > { %707 = vadd.xlane.f32.xlu1 %v690_v52 }
 0x2a4   : > { %v694_v45 = vpop.xlane.xlu0 %693 }
 0x2a5   : > { %v710_v53 = vmul.f32 0.0078125, %v694_v45 }
 0x2a7   : > { %v1415_v44 = vsub.f32 %v663_v30, %v710_v53 }
 0x2a8   : > { %v696_v56 = vpop.xlane.xlu1 %695  ;;  %v702_v55 = vpop.xlane.xlu0 %701 }
 0x2a9   : > { %v711_v54 = vmul.f32 0.0078125, %v696_v56  ;;  %v714_v57 = vmul.f32 0.0078125, %v702_v55  ;;  %v726_v60 = vmul.f32 %v1415_v44, %v1415_v44 }
 0x2ab   : > { %v1419_v61 = vsub.f32 %v666_v33, %v711_v54  ;;  %v1421_v62 = vsub.f32 %v679_v34, %v714_v57  ;;  %734 = vadd.xlane.f32.xlu0 %v726_v60 }
 0x2ac   : > { %v704_v63 = vpop.xlane.xlu1 %703  ;;  %v698_v0 = vpop.xlane.xlu0 %697 }
 0x2ad   : > { %v715_v1 = vmul.f32 0.0078125, %v704_v63  ;;  %v712_v2 = vmul.f32 0.0078125, %v698_v0  ;;  %v727_v3 = vmul.f32 %v1419_v61, %v1419_v61  ;;  %v730_v4 = vmul.f32 %v1421_v62, %v1421_v62 }
 0x2af   : > { %v1427_v59 = vsub.f32 %v682_v32, %v715_v1  ;;  %v1429_v58 = vsub.f32 %v671_v31, %v712_v2  ;;  %736 = vadd.xlane.f32.xlu1 %v727_v3  ;;  %742 = vadd.xlane.f32.xlu0 %v730_v4 }
 0x2b0   : > { %v700_v6 = vpop.xlane.xlu1 %699  ;;  %v706_v5 = vpop.xlane.xlu0 %705 }
 0x2b1   : > { %v713_v7 = vmul.f32 0.0078125, %v700_v6  ;;  %v716_v10 = vmul.f32 0.0078125, %v706_v5  ;;  %v731_v11 = vmul.f32 %v1427_v59, %v1427_v59  ;;  %v728_v12 = vmul.f32 %v1429_v58, %v1429_v58 }
 0x2b3   : > { %v1435_v15 = vsub.f32 %v674_v48, %v713_v7  ;;  %v1437_v16 = vsub.f32 %v687_v49, %v716_v10  ;;  %744 = vadd.xlane.f32.xlu1 %v731_v11  ;;  %738 = vadd.xlane.f32.xlu0 %v728_v12  ;;  %v922_v48 = vld [vmem:[%s1531_s6] ss:$0 sm:$0xff] }
 0x2b4   : > { %v708_v17 = vpop.xlane.xlu1 %707 }
 0x2b5   : > { %v717_v18 = vmul.f32 0.0078125, %v708_v17  ;;  %v729_v19 = vmul.f32 %v1435_v15, %v1435_v15  ;;  %v732_v20 = vmul.f32 %v1437_v16, %v1437_v16 }
 0x2b7   : > { %v1443_v23 = vsub.f32 %v690_v52, %v717_v18  ;;  %740 = vadd.xlane.f32.xlu1 %v729_v19  ;;  %746 = vadd.xlane.f32.xlu0 %v732_v20 }
 0x2b9   : > { %v733_v8 = vmul.f32 %v1443_v23, %v1443_v23 }
 0x2bb   : > { %748 = vadd.xlane.f32.xlu1 %v733_v8 }
 0x334   : > { %v735_v9 = vpop.xlane.xlu0 %734 }
 0x335   : > { %v750_v14 = vmul.f32 0.0078125, %v735_v9 }
 0x337   : > { %v758_v24 = vadd.f32 1e-05, %v750_v14 }
 0x338   : > { %v737_v13 = vpop.xlane.xlu1 %736  ;;  %v743_v25 = vpop.xlane.xlu0 %742 }
 0x339   : > { %1059 = vrsqrt.f32 %v758_v24  ;;  %v751_v30 = vmul.f32 0.0078125, %v737_v13  ;;  %v754_v22 = vmul.f32 0.0078125, %v743_v25 }
 0x33b   : > { %v759_v26 = vadd.f32 1e-05, %v751_v30  ;;  %v762_v27 = vadd.f32 1e-05, %v754_v22 }
 0x33c   : > { %v745_v29 = vpop.xlane.xlu1 %744  ;;  %v739_v21 = vpop.xlane.xlu0 %738 }
 0x33d   : > { %1061 = vrsqrt.f32 %v759_v26  ;;  %v755_v28 = vmul.f32 0.0078125, %v745_v29  ;;  %v752_v33 = vmul.f32 0.0078125, %v739_v21 }
 0x33e   : > { %1063 = vrsqrt.f32 %v762_v27 }
 0x33f   : > { %v763_v34 = vadd.f32 1e-05, %v755_v28  ;;  %v760_v35 = vadd.f32 1e-05, %v752_v33 }
 0x340   : > { %v741_v36 = vpop.xlane.xlu1 %740  ;;  %v747_v37 = vpop.xlane.xlu0 %746 }
 0x341   : > { %1065 = vrsqrt.f32 %v763_v34  ;;  %v753_v38 = vmul.f32 0.0078125, %v741_v36  ;;  %v756_v42 = vmul.f32 0.0078125, %v747_v37 }
 0x342   : > { %1067 = vrsqrt.f32 %v760_v35 }
 0x343   : > { %v761_v41 = vadd.f32 1e-05, %v753_v38  ;;  %v764_v32 = vadd.f32 1e-05, %v756_v42 }
 0x344   : > { %v749_v31 = vpop.xlane.xlu1 %748 }
 0x345   : > { %1069 = vrsqrt.f32 %v761_v41  ;;  %v757_v39 = vmul.f32 0.0078125, %v749_v31 }
 0x346   : > { %v1060_v40 = vpop.eup %1059  ;;  %1071 = vrsqrt.f32 %v764_v32 }
 0x347   : > { %v774_v46 = vmul.f32 %v1060_v40, %v1415_v44  ;;  %v765_v47 = vadd.f32 1e-05, %v757_v39 }
 0x349   : > { %v789_v49 = vmul.f32 %v921_v43, %v774_v46  ;;  %1073 = vrsqrt.f32 %v765_v47 }
 0x34a   : > { %v1062_v50 = vpop.eup %1061 }
 0x34b   : > { %v1064_v51 = vpop.eup %1063  ;;  %v804_v52 = vadd.f32 %v922_v48, %v789_v49  ;;  %v775_v45 = vmul.f32 %v1062_v50, %v1419_v61 }
 0x34c   : > { %v778_v53 = vmul.f32 %v1064_v51, %v1421_v62 }
 0x34d   : > { %812 = vst [vmem:[%s1459_s20] sm:$0xff] %v804_v52  ;;  %v790_v44 = vmul.f32 %v921_v43, %v775_v45 }
 0x34e   : > { %v1066_v56 = vpop.eup %1065  ;;  %v793_v55 = vmul.f32 %v921_v43, %v778_v53 }
 0x34f   : > { %v1068_v54 = vpop.eup %1067  ;;  %v805_v57 = vadd.f32 %v922_v48, %v790_v44  ;;  %v779_v60 = vmul.f32 %v1066_v56, %v1427_v59 }
 0x350   : > { %v808_v63 = vadd.f32 %v922_v48, %v793_v55  ;;  %v776_v61 = vmul.f32 %v1068_v54, %v1429_v58 }
 0x351   : > { %813 = vst [vmem:[%s1459_s20 + $0x8] sm:$0xff] %v805_v57  ;;  %v794_v62 = vmul.f32 %v921_v43, %v779_v60 }
 0x352   : > { %v1070_v0 = vpop.eup %1069  ;;  %816 = vst [vmem:[%s1459_s20 + $0x20] sm:$0xff] %v808_v63  ;;  %v791_v1 = vmul.f32 %v921_v43, %v776_v61 }
 0x353   : > { %v1072_v2 = vpop.eup %1071  ;;  %v809_v3 = vadd.f32 %v922_v48, %v794_v62  ;;  %v777_v4 = vmul.f32 %v1070_v0, %v1435_v15 }
 0x354   : > { %v806_v6 = vadd.f32 %v922_v48, %v791_v1  ;;  %v780_v59 = vmul.f32 %v1072_v2, %v1437_v16 }
 0x355   : > { %817 = vst [vmem:[%s1459_s20 + $0x28] sm:$0xff] %v809_v3  ;;  %v792_v5 = vmul.f32 %v921_v43, %v777_v4 }
 0x356   : > { %v1074_v58 = vpop.eup %1073  ;;  %814 = vst [vmem:[%s1459_s20 + $0x10] sm:$0xff] %v806_v6  ;;  %v795_v7 = vmul.f32 %v921_v43, %v780_v59 }
 0x357   : > { %v807_v10 = vadd.f32 %v922_v48, %v792_v5  ;;  %v781_v11 = vmul.f32 %v1074_v58, %v1443_v23 }
 0x358   : > { %v810_v12 = vadd.f32 %v922_v48, %v795_v7 }
 0x359   : > { %815 = vst [vmem:[%s1459_s20 + $0x18] sm:$0xff] %v807_v10  ;;  %v796_v17 = vmul.f32 %v921_v43, %v781_v11 }
 0x35a   : > { %818 = vst [vmem:[%s1459_s20 + $0x30] sm:$0xff] %v810_v12 }
 0x35b   : > { %v811_v15 = vadd.f32 %v922_v48, %v796_v17 }
 0x35d   : > { %819 = vst [vmem:[%s1459_s20 + $0x38] sm:$0xff] %v811_v15 }
 0x35e   : > { %1088 = shalt.err (!%p1085_p3)
}
 0x35f   : > { %s1089_s14 = scalar_lea.hbm %s1478_s8, 1024  ;;  %s1093_s19 = scalar_lea.hbm %s1532_s7, 2048 }
 0x360   : > { %p1090_p4 = scmp.ne.s32.totalorder %s1478_s8, %s1089_s14  ;;  %p1094_p9 = scmp.lt.s32.totalorder %s1478_s8, %s1532_s7 }
 0x361   : > { %p1095_p10 = scmp.lt.s32.totalorder %s1093_s19, %s1089_s14 }
 0x362   : > { %p1091_p7 = pnand %p1090_p4, %p1218_p5 }
 0x363   : > { %p1096_p11 = por %p1095_p10, %p1094_p9 }
 0x364   : > { %p1092_p8 = pneg %p1091_p7 }
 0x366   : > { %p1097_p12 = pnand %p1096_p11, %p1092_p8 }
 0x368   : > { %1100 = shalt.err (!%p1097_p12)
}
 0x369   : > { %s1138_s23 = smov 128   ;;  %s1139_s29 = smov 8  }
 0x36a   : > { %986 = dma.vmem_to_hbm [thread:$0]  (%p1218_p5), %s1480_s22, 1024, %s1478_s8, %s1485_s9, %s1138_s23, %s1138_s23, %s1139_s29  }
 0x36b PF: > { %p992_p13 = scmp.ge.s32.totalorder %s1135_s27, 2  ;;  %s849_s28 = sand.u32 1, %s1123_s24  }
 0x36c   : > { %s850_s13 = scalar_lea.sflag [#allocation3], %s849_s28 }
 0x36d   : > { %p989_p0 = pnand %p992_p13, %p1222_p6 }
 0x36f   : > { %p990_p1 = pneg %p989_p0 }
 0x371   : > { %1118 = dma.done.wait (%p990_p1), %s850_s13, 1024  }
 0x372   : > { %1120 = vsyncadd (%p990_p1), %s850_s13, 4294966272  ;;  %p17_p2 = scmp.ge.s32.totalorder %s1205_s30, 4   ;;  %s1535_s24 = smov %s1127_s25 }
 0x373   : > { %s1536_s25 = smov %s1131_s26  ;;  %s1537_s26 = smov %s1216_s10 }
 0x374   : > { %s1538_s27 = smov %s1205_s30  ;;  %19 = sbr.rel (!%p17_p2) target bundleno = 3 (0x3), region = 83 }
 0x379   :  { %855 = vsyncpa [#allocation3], 1 }
 0x37a   :  { %857 = vsyncpa [#allocation3 + $0x1], 1 }

</bundles_post_ra>
